<compile_context>
chip_gen: v6e
topology: v6e:2x2x1
jax: 0.10.0
libtpu: 0.0.40
codegen_flags: <defaults>
</compile_context>

<pallas_src>
import functools

import jax
import jax.numpy as jnp
from jax.experimental import pallas as pl
from jax.experimental.pallas import tpu as pltpu


def _round_up(x, m):
    return ((x + m - 1) // m) * m


def _point_encoder_kernel(pts_ref, w1_ref, b1_ref, w2_ref, b2_ref,
                          w3_ref, b3_ref, pooled_ref, *, use_bf16):
    ki = pl.program_id(1)

    x = pts_ref[...]                                   # (TB, TN, F) f32
    tb, tn, feat = x.shape
    x2 = x.reshape(tb * tn, feat)                      # flatten batch*points

    # ---- MLP1 (K = feat_dim = 5): tiny contraction on the VPU, not worth an
    # MXU push/pop round trip.
    w1 = w1_ref[...]                                   # (F, 64) f32
    h = x2[:, 0:1] * w1[0:1, :]
    for f in range(1, feat):
        h = h + x2[:, f:f + 1] * w1[f:f + 1, :]
    h = jnp.maximum(h + b1_ref[...], 0.0)              # (M, 64) f32

    # ---- MLP2 / MLP3 on the MXU: bf16 operands, f32 accumulation.
    mxu_dtype = jnp.bfloat16 if use_bf16 else jnp.float32
    h = jnp.dot(h.astype(mxu_dtype), w2_ref[...],
                preferred_element_type=jnp.float32) + b2_ref[...]
    h = jnp.maximum(h, 0.0)                            # (M, 128) f32
    h = jnp.dot(h.astype(mxu_dtype), w3_ref[...],
                preferred_element_type=jnp.float32) + b3_ref[...]
    h = jnp.maximum(h, 0.0)                            # (M, emb) f32

    emb = h.shape[1]
    # Per-cloud max over this point tile (torch: x.max(dim=1)[0]).
    tile_max = jnp.max(h.reshape(tb, tn, emb), axis=1, keepdims=True)  # (TB,1,emb)

    # Running max over point tiles, accumulated directly in the resident
    # output block (same output block index for every ki).
    @pl.when(ki == 0)
    def _init():
        pooled_ref[...] = tile_max

    @pl.when(ki > 0)
    def _accum():
        pooled_ref[...] = jnp.maximum(pooled_ref[...], tile_max)


def point_encoder_pallas(pts, params, *, use_bf16=True,
                         max_tile_n=2048, target_rows=2048):
    """pts: (B, N, F) float32.  params: [in, out] weights and (1, out) biases."""
    B, N, F = pts.shape
    h1 = params["w1"].shape[1]       # 64
    h2 = params["w2"].shape[1]       # 128
    emb = params["w3"].shape[1]      # 128

    # Point tiling: multiples of 8 sublanes, as large as N allows (per-step
    # grid overhead dominates small tiles).
    tile_n = min(_round_up(N, 8), max_tile_n)
    n_pad = _round_up(N, tile_n)
    nt = n_pad // tile_n

    # Batch packing: pack enough clouds per step that the flattened MXU tile
    # has roughly target_rows rows.
    tile_b = max(1, min(B, target_rows // tile_n))
    b_pad = _round_up(B, tile_b)
    nb = b_pad // tile_b

    # v7x (2 TCs/chip): if everything collapsed into one parallel step but
    # halving the batch tile still leaves MXU-sized (>=512-row) steps, split.
    if nb == 1 and tile_b > 1 and (tile_b // 2) * tile_n >= 512:
        tile_b = -(-tile_b // 2)
        b_pad = _round_up(B, tile_b)
        nb = b_pad // tile_b

    # Edge-pad (replicate) the batch / point axes: padded points reproduce a
    # real point, so the max-pool needs no in-kernel mask; padded batch rows
    # are sliced off below.
    if (b_pad, n_pad) != (B, N):
        pts = jnp.pad(pts, ((0, b_pad - B), (0, n_pad - N), (0, 0)), mode="edge")
    pts = pts.astype(jnp.float32)

    mxu_dtype = jnp.bfloat16 if use_bf16 else jnp.float32
    w1 = params["w1"].astype(jnp.float32)
    b1 = params["b1"].astype(jnp.float32)
    w2 = params["w2"].astype(mxu_dtype)     # stored bf16 once, not per step
    b2 = params["b2"].astype(jnp.float32)
    w3 = params["w3"].astype(mxu_dtype)
    b3 = params["b3"].astype(jnp.float32)

    kernel = functools.partial(_point_encoder_kernel, use_bf16=use_bf16)

    grid_spec = pltpu.PrefetchScalarGridSpec(
        num_scalar_prefetch=0,
        grid=(nb, nt),
        in_specs=[
            # One (tile_b, tile_n, F) slab of points per step.
            pl.BlockSpec((tile_b, tile_n, F), lambda bi, ki: (bi, ki, 0)),
            # Weights / biases stay resident in VMEM (constant index maps).
            pl.BlockSpec((F, h1), lambda bi, ki: (0, 0)),          # w1
            pl.BlockSpec((1, h1), lambda bi, ki: (0, 0)),          # b1
            pl.BlockSpec((h1, h2), lambda bi, ki: (0, 0)),         # w2
            pl.BlockSpec((1, h2), lambda bi, ki: (0, 0)),          # b2
            pl.BlockSpec((h2, emb), lambda bi, ki: (0, 0)),        # w3
            pl.BlockSpec((1, emb), lambda bi, ki: (0, 0)),         # b3
        ],
        # Lane-dense (emb = 128) pooled embedding, one block per batch tile.
        out_specs=pl.BlockSpec((tile_b, 1, emb), lambda bi, ki: (bi, 0, 0)),
    )

    pooled = pl.pallas_call(
        kernel,
        out_shape=jax.ShapeDtypeStruct((b_pad, 1, emb), jnp.float32),
        grid_spec=grid_spec,
        compiler_params=pltpu.CompilerParams(
            dimension_semantics=("parallel", "arbitrary"),
            vmem_limit_bytes=32 * 1024 * 1024),
    )(pts, w1, b1, w2, b2, w3, b3)

    pooled = pooled[:B, 0, :]                                      # (B, emb)

    # Tiny (emb -> 3) head + L2-normalize in plain XLA (keeps the kernel's
    # output lane-dense and the M=1/N=3 dot + rsqrt out of the hot loop).
    logits = pooled @ params["w4"].astype(jnp.float32) + params["b4"].astype(jnp.float32)[0]
    norm = jnp.maximum(jnp.linalg.norm(logits, axis=1, keepdims=True), 1e-12)
    return logits / norm


def make_params(key, feat_dim=5, emb_dim=128):
    """Deterministic init.  Weights stored as [in, out] (torch stores [out, in])."""
    ks = jax.random.split(key, 8)

    def lin(kw, kb, fan_in, fan_out):
        bound = 1.0 / jnp.sqrt(fan_in)
        w = jax.random.uniform(kw, (fan_in, fan_out), jnp.float32, -bound, bound)
        b = jax.random.uniform(kb, (1, fan_out), jnp.float32, -bound, bound)
        return w, b

    w1, b1 = lin(ks[0], ks[1], feat_dim, 64)
    w2, b2 = lin(ks[2], ks[3], 64, 128)
    w3, b3 = lin(ks[4], ks[5], 128, emb_dim)
    w4, b4 = lin(ks[6], ks[7], emb_dim, 3)
    return {"w1": w1, "b1": b1, "w2": w2, "b2": b2,
            "w3": w3, "b3": b3, "w4": w4, "b4": b4}


def point_encoder_ref(pts, p):
    """Pure-JAX reference matching the PyTorch forward."""
    x = jax.nn.relu(pts @ p["w1"] + p["b1"][0])
    x = jax.nn.relu(x @ p["w2"] + p["b2"][0])
    x = jax.nn.relu(x @ p["w3"] + p["b3"][0])
    x = jnp.max(x, axis=1)
    n = x @ p["w4"] + p["b4"][0]
    return n / jnp.maximum(jnp.linalg.norm(n, axis=1, keepdims=True), 1e-12)


if __name__ == "__main__":
    key = jax.random.PRNGKey(0)
    kp, kx, ky = jax.random.split(key, 3)

    B, N, F = 2, 16, 5   # batch=2, 16 points per cloud, 5 features per point
    params = make_params(kp, feat_dim=F, emb_dim=128)
    pts = jax.random.normal(kx, (B, N, F), dtype=jnp.float32)

    # f32 path: tight check against the pure-JAX / PyTorch-equivalent reference.
    out_f32 = jax.block_until_ready(point_encoder_pallas(pts, params, use_bf16=False))
    ref_f32 = point_encoder_ref(pts, params)
    assert out_f32.shape == (B, 3)
    assert jnp.allclose(out_f32, ref_f32, atol=1e-3, rtol=1e-3), (out_f32, ref_f32)

    # Default bf16-MXU-operand path: loose sanity check against the f32
    # reference (bf16 operands, f32 accumulation).
    out_bf16 = jax.block_until_ready(point_encoder_pallas(pts, params))
    assert out_bf16.shape == (B, 3)
    assert jnp.allclose(out_bf16, ref_f32, atol=5e-2, rtol=5e-2), (out_bf16, ref_f32)

    # Multi-tile path: several point tiles per cloud (running max across the
    # "arbitrary" grid axis) plus edge padding of the point axis.
    B2, N2 = 3, 300
    pts2 = jax.random.normal(ky, (B2, N2, F), dtype=jnp.float32)
    out2 = jax.block_until_ready(
        point_encoder_pallas(pts2, params, use_bf16=False, max_tile_n=128))
    ref2 = point_encoder_ref(pts2, params)
    assert out2.shape == (B2, 3)
    assert jnp.allclose(out2, ref2, atol=1e-3, rtol=1e-3), (out2, ref2)

    print("KERNEL_OK")
</pallas_src>

<mosaic_0001>
module attributes {stable_mosaic.version = 11 : i64} {
  func.func @_point_encoder_kernel(%arg0: i32, %arg1: i32, %arg2: memref<2x16x5xf32, #tpu.memory_space<vmem>>, %arg3: memref<5x64xf32, #tpu.memory_space<vmem>>, %arg4: memref<1x64xf32, #tpu.memory_space<vmem>>, %arg5: memref<64x128xf32, #tpu.memory_space<vmem>>, %arg6: memref<1x128xf32, #tpu.memory_space<vmem>>, %arg7: memref<128x128xf32, #tpu.memory_space<vmem>>, %arg8: memref<1x128xf32, #tpu.memory_space<vmem>>, %arg9: memref<2x1x128xf32, #tpu.memory_space<vmem>>) attributes {dimension_semantics = [#tpu.dimension_semantics<parallel>, #tpu.dimension_semantics<arbitrary>], iteration_bounds = array<i64: 1, 1>, scalar_prefetch = 0 : i64, scratch_operands = 0 : i64, tpu.core_type = #tpu.core_type<tc>, window_params = [{transform_indices = @transform_0, window_bounds = array<i64: 2, 16, 5>}, {pipeline_mode = #tpu.pipeline_mode<synchronous>, transform_indices = @transform_1, window_bounds = array<i64: 5, 64>}, {pipeline_mode = #tpu.pipeline_mode<synchronous>, transform_indices = @transform_2, window_bounds = array<i64: 1, 64>}, {pipeline_mode = #tpu.pipeline_mode<synchronous>, transform_indices = @transform_3, window_bounds = array<i64: 64, 128>}, {pipeline_mode = #tpu.pipeline_mode<synchronous>, transform_indices = @transform_4, window_bounds = array<i64: 1, 128>}, {pipeline_mode = #tpu.pipeline_mode<synchronous>, transform_indices = @transform_5, window_bounds = array<i64: 128, 128>}, {pipeline_mode = #tpu.pipeline_mode<synchronous>, transform_indices = @transform_6, window_bounds = array<i64: 1, 128>}, {transform_indices = @transform_7, window_bounds = array<i64: 2, 1, 128>}]} {
    %c0 = arith.constant 0 : index
    %c0_0 = arith.constant 0 : index
    %c0_1 = arith.constant 0 : index
    %0 = vector.load %arg2[%c0, %c0_0, %c0_1] : memref<2x16x5xf32, #tpu.memory_space<vmem>>, vector<2x16x5xf32>
    %1 = vector.shape_cast %0 : vector<2x16x5xf32> to vector<32x5xf32>
    %c0_2 = arith.constant 0 : index
    %c0_3 = arith.constant 0 : index
    %2 = vector.load %arg3[%c0_2, %c0_3] : memref<5x64xf32, #tpu.memory_space<vmem>>, vector<5x64xf32>
    %3 = vector.extract_strided_slice %1 {offsets = [0, 0], sizes = [32, 1], strides = [1, 1]} : vector<32x5xf32> to vector<32x1xf32>
    %4 = vector.extract_strided_slice %2 {offsets = [0, 0], sizes = [1, 64], strides = [1, 1]} : vector<5x64xf32> to vector<1x64xf32>
    %5 = vector.broadcast %3 : vector<32x1xf32> to vector<32x64xf32>
    %6 = vector.broadcast %4 : vector<1x64xf32> to vector<32x64xf32>
    %7 = arith.mulf %5, %6 : vector<32x64xf32>
    %8 = vector.extract_strided_slice %1 {offsets = [0, 1], sizes = [32, 1], strides = [1, 1]} : vector<32x5xf32> to vector<32x1xf32>
    %9 = vector.extract_strided_slice %2 {offsets = [1, 0], sizes = [1, 64], strides = [1, 1]} : vector<5x64xf32> to vector<1x64xf32>
    %10 = vector.broadcast %8 : vector<32x1xf32> to vector<32x64xf32>
    %11 = vector.broadcast %9 : vector<1x64xf32> to vector<32x64xf32>
    %12 = arith.mulf %10, %11 : vector<32x64xf32>
    %13 = arith.addf %7, %12 : vector<32x64xf32>
    %14 = vector.extract_strided_slice %1 {offsets = [0, 2], sizes = [32, 1], strides = [1, 1]} : vector<32x5xf32> to vector<32x1xf32>
    %15 = vector.extract_strided_slice %2 {offsets = [2, 0], sizes = [1, 64], strides = [1, 1]} : vector<5x64xf32> to vector<1x64xf32>
    %16 = vector.broadcast %14 : vector<32x1xf32> to vector<32x64xf32>
    %17 = vector.broadcast %15 : vector<1x64xf32> to vector<32x64xf32>
    %18 = arith.mulf %16, %17 : vector<32x64xf32>
    %19 = arith.addf %13, %18 : vector<32x64xf32>
    %20 = vector.extract_strided_slice %1 {offsets = [0, 3], sizes = [32, 1], strides = [1, 1]} : vector<32x5xf32> to vector<32x1xf32>
    %21 = vector.extract_strided_slice %2 {offsets = [3, 0], sizes = [1, 64], strides = [1, 1]} : vector<5x64xf32> to vector<1x64xf32>
    %22 = vector.broadcast %20 : vector<32x1xf32> to vector<32x64xf32>
    %23 = vector.broadcast %21 : vector<1x64xf32> to vector<32x64xf32>
    %24 = arith.mulf %22, %23 : vector<32x64xf32>
    %25 = arith.addf %19, %24 : vector<32x64xf32>
    %26 = vector.extract_strided_slice %1 {offsets = [0, 4], sizes = [32, 1], strides = [1, 1]} : vector<32x5xf32> to vector<32x1xf32>
    %27 = vector.extract_strided_slice %2 {offsets = [4, 0], sizes = [1, 64], strides = [1, 1]} : vector<5x64xf32> to vector<1x64xf32>
    %28 = vector.broadcast %26 : vector<32x1xf32> to vector<32x64xf32>
    %29 = vector.broadcast %27 : vector<1x64xf32> to vector<32x64xf32>
    %30 = arith.mulf %28, %29 : vector<32x64xf32>
    %31 = arith.addf %25, %30 : vector<32x64xf32>
    %c0_4 = arith.constant 0 : index
    %c0_5 = arith.constant 0 : index
    %32 = vector.load %arg4[%c0_4, %c0_5] : memref<1x64xf32, #tpu.memory_space<vmem>>, vector<1x64xf32>
    %33 = vector.broadcast %32 : vector<1x64xf32> to vector<32x64xf32>
    %34 = arith.addf %31, %33 : vector<32x64xf32>
    %cst = arith.constant 0.000000e+00 : f32
    %35 = vector.broadcast %cst : f32 to vector<32x64xf32>
    %36 = arith.maximumf %34, %35 : vector<32x64xf32>
    %c0_6 = arith.constant 0 : index
    %c0_7 = arith.constant 0 : index
    %37 = vector.load %arg5[%c0_6, %c0_7] : memref<64x128xf32, #tpu.memory_space<vmem>>, vector<64x128xf32>
    %cst_8 = arith.constant dense<0.000000e+00> : vector<32x128xf32>
    %38 = tpu.matmul %36, %37, %cst_8 {dimension_numbers = #tpu.dot_dimension_numbers<[1], [0], [0], [1], [0, 0, 1, 1], [], []>} : vector<32x64xf32>, vector<64x128xf32>, vector<32x128xf32> -> vector<32x128xf32>
    %c0_9 = arith.constant 0 : index
    %c0_10 = arith.constant 0 : index
    %39 = vector.load %arg6[%c0_9, %c0_10] : memref<1x128xf32, #tpu.memory_space<vmem>>, vector<1x128xf32>
    %40 = vector.broadcast %39 : vector<1x128xf32> to vector<32x128xf32>
    %41 = arith.addf %38, %40 : vector<32x128xf32>
    %cst_11 = arith.constant 0.000000e+00 : f32
    %42 = vector.broadcast %cst_11 : f32 to vector<32x128xf32>
    %43 = arith.maximumf %41, %42 : vector<32x128xf32>
    %c0_12 = arith.constant 0 : index
    %c0_13 = arith.constant 0 : index
    %44 = vector.load %arg7[%c0_12, %c0_13] : memref<128x128xf32, #tpu.memory_space<vmem>>, vector<128x128xf32>
    %cst_14 = arith.constant dense<0.000000e+00> : vector<32x128xf32>
    %45 = tpu.matmul %43, %44, %cst_14 {dimension_numbers = #tpu.dot_dimension_numbers<[1], [0], [0], [1], [0, 0, 1, 1], [], []>} : vector<32x128xf32>, vector<128x128xf32>, vector<32x128xf32> -> vector<32x128xf32>
    %c0_15 = arith.constant 0 : index
    %c0_16 = arith.constant 0 : index
    %46 = vector.load %arg8[%c0_15, %c0_16] : memref<1x128xf32, #tpu.memory_space<vmem>>, vector<1x128xf32>
    %47 = vector.broadcast %46 : vector<1x128xf32> to vector<32x128xf32>
    %48 = arith.addf %45, %47 : vector<32x128xf32>
    %cst_17 = arith.constant 0.000000e+00 : f32
    %49 = vector.broadcast %cst_17 : f32 to vector<32x128xf32>
    %50 = arith.maximumf %48, %49 : vector<32x128xf32>
    %51 = vector.shape_cast %50 : vector<32x128xf32> to vector<2x16x128xf32>
    %cst_18 = arith.constant dense<0xFF800000> : vector<2x128xf32>
    %52 = vector.multi_reduction <maximumf>, %51, %cst_18 [1] : vector<2x16x128xf32> to vector<2x128xf32>
    %53 = vector.shape_cast %52 : vector<2x128xf32> to vector<2x1x128xf32>
    %c0_i32 = arith.constant 0 : i32
    %54 = arith.cmpi eq, %arg1, %c0_i32 : i32
    %55 = arith.extui %54 : i1 to i32
    %c0_i32_19 = arith.constant 0 : i32
    %56 = arith.cmpi ne, %55, %c0_i32_19 : i32
    scf.if %56 {
      %c0_22 = arith.constant 0 : index
      %c0_23 = arith.constant 0 : index
      %c0_24 = arith.constant 0 : index
      %60 = vector.load %arg9[%c0_22, %c0_23, %c0_24] : memref<2x1x128xf32, #tpu.memory_space<vmem>>, vector<2x1x128xf32>
      tpu.vector_store %arg9[%c0_22, %c0_23, %c0_24], %53 {strides = array<i32>} : memref<2x1x128xf32, #tpu.memory_space<vmem>>, vector<2x1x128xf32>,
    } else {
    }
    %c0_i32_20 = arith.constant 0 : i32
    %57 = arith.cmpi sgt, %arg1, %c0_i32_20 : i32
    %58 = arith.extui %57 : i1 to i32
    %c0_i32_21 = arith.constant 0 : i32
    %59 = arith.cmpi ne, %58, %c0_i32_21 : i32
    scf.if %59 {
      %c0_22 = arith.constant 0 : index
      %c0_23 = arith.constant 0 : index
      %c0_24 = arith.constant 0 : index
      %60 = vector.load %arg9[%c0_22, %c0_23, %c0_24] : memref<2x1x128xf32, #tpu.memory_space<vmem>>, vector<2x1x128xf32>
      %61 = arith.maximumf %60, %53 : vector<2x1x128xf32>
      %c0_25 = arith.constant 0 : index
      %c0_26 = arith.constant 0 : index
      %c0_27 = arith.constant 0 : index
      %62 = vector.load %arg9[%c0_25, %c0_26, %c0_27] : memref<2x1x128xf32, #tpu.memory_space<vmem>>, vector<2x1x128xf32>
      tpu.vector_store %arg9[%c0_25, %c0_26, %c0_27], %61 {strides = array<i32>} : memref<2x1x128xf32, #tpu.memory_space<vmem>>, vector<2x1x128xf32>,
    } else {
    }
    return
  }
  func.func @transform_0(%arg0: i32, %arg1: i32) -> (i32, i32, i32) {
    %c0_i32 = arith.constant 0 : i32
    %c0_i32_0 = arith.constant 0 : i32
    return %arg0, %arg1, %c0_i32 : i32, i32, i32
  }
  func.func @transform_1(%arg0: i32, %arg1: i32) -> (i32, i32) {
    %c0_i32 = arith.constant 0 : i32
    %c0_i32_0 = arith.constant 0 : i32
    %c0_i32_1 = arith.constant 0 : i32
    return %c0_i32, %c0_i32_0 : i32, i32
  }
  func.func @transform_2(%arg0: i32, %arg1: i32) -> (i32, i32) {
    %c0_i32 = arith.constant 0 : i32
    %c0_i32_0 = arith.constant 0 : i32
    %c0_i32_1 = arith.constant 0 : i32
    return %c0_i32, %c0_i32_0 : i32, i32
  }
  func.func @transform_3(%arg0: i32, %arg1: i32) -> (i32, i32) {
    %c0_i32 = arith.constant 0 : i32
    %c0_i32_0 = arith.constant 0 : i32
    %c0_i32_1 = arith.constant 0 : i32
    return %c0_i32, %c0_i32_0 : i32, i32
  }
  func.func @transform_4(%arg0: i32, %arg1: i32) -> (i32, i32) {
    %c0_i32 = arith.constant 0 : i32
    %c0_i32_0 = arith.constant 0 : i32
    %c0_i32_1 = arith.constant 0 : i32
    return %c0_i32, %c0_i32_0 : i32, i32
  }
  func.func @transform_5(%arg0: i32, %arg1: i32) -> (i32, i32) {
    %c0_i32 = arith.constant 0 : i32
    %c0_i32_0 = arith.constant 0 : i32
    %c0_i32_1 = arith.constant 0 : i32
    return %c0_i32, %c0_i32_0 : i32, i32
  }
  func.func @transform_6(%arg0: i32, %arg1: i32) -> (i32, i32) {
    %c0_i32 = arith.constant 0 : i32
    %c0_i32_0 = arith.constant 0 : i32
    %c0_i32_1 = arith.constant 0 : i32
    return %c0_i32, %c0_i32_0 : i32, i32
  }
  func.func @transform_7(%arg0: i32, %arg1: i32) -> (i32, i32, i32) {
    %c0_i32 = arith.constant 0 : i32
    %c0_i32_0 = arith.constant 0 : i32
    %c0_i32_1 = arith.constant 0 : i32
    return %arg0, %c0_i32, %c0_i32_0 : i32, i32, i32
  }
}

</mosaic_0001>

<bundles_post_ra>
// kernel: tpu_custom_call.1
= control target key start
LH: loop header
LB: loop body
LE: loop exit
PB: predicated region body
PF: predicated region fallthrough
CT: control target
= control target key end

     0   :  { %12 = vsyncpa [#allocation3], 0  ;;  %s775_s0 = inlined_call_operand.vmem [shape: f32[2,16,5], index: 0, kind: input, shape index: {}]   ;;  %s776_s1 = inlined_call_operand.vmem [shape: f32[5,64], index: 1, kind: input, shape index: {}]   ;;  %s777_s2 = inlined_call_operand.vmem [shape: f32[1,64], index: 2, kind: input, shape index: {}]   ;;  %s778_s3 = inlined_call_operand.hbm [shape: f32[64,128], index: 3, kind: input, shape index: {}]   ;;  %s779_s4 = inlined_call_operand.vmem [shape: f32[1,128], index: 4, kind: input, shape index: {}]   ;;  %s780_s5 = inlined_call_operand.hbm [shape: f32[128,128], index: 5, kind: input, shape index: {}]   ;;  %s781_s6 = inlined_call_operand.vmem [shape: f32[1,128], index: 6, kind: input, shape index: {}]   ;;  %s782_s7 = inlined_call_operand.hbm [shape: f32[2,1,128], index: 7, kind: output, shape index: {}]  }
   0x1   :  { %13 = vsyncpa [#allocation6], 0 }
   0x2   :  { %14 = vsyncpa [#allocation4], 0  ;;  %s686_s24 = smov [#allocation2]  }
   0x3   :  { %s26_s25 = sshll.u32 %s686_s24, 4  ;;  %s27_s25 = int_to_ptr.vmem [resolvable:$true] %s26_s25 }
   0x4   :  { %s628_s26 = scalar_lea.vmem %s27_s25, 1024  ;;  %p633_p1 = scmp.lt.s32.totalorder %s27_s25, %s27_s25 }
   0x5   :  { %p629_p0 = scmp.ne.s32.totalorder %s27_s25, %s628_s26  ;;  %p634_p2 = scmp.lt.s32.totalorder %s628_s26, %s628_s26 }
   0x7   :  { %p635_p3 = por %p634_p2, %p633_p1 }
   0x9   :  { %p636_p4 = pnand %p635_p3, %p629_p0 }
   0xb   :  { %639 = shalt.err (!%p636_p4)
}
   0xc   :  { %s687_s27 = smov 128   ;;  %s688_s28 = smov 8  }
   0xd   :  { %32 = dma.hbm_to_vmem [thread:$0]  %s778_s3, 1024, %s27_s25, [#allocation3], %s687_s27, %s687_s27, %s688_s28  }
   0xe   :  { %s689_s8 = smov [#allocation5]  }
   0xf   :  { %s40_s9 = sshll.u32 %s689_s8, 4  ;;  %s41_s9 = int_to_ptr.vmem [resolvable:$true] %s40_s9 }
  0x10   :  { %s648_s10 = scalar_lea.vmem %s41_s9, 2048  ;;  %p653_p6 = scmp.lt.s32.totalorder %s41_s9, %s41_s9 }
  0x11   :  { %p649_p5 = scmp.ne.s32.totalorder %s41_s9, %s648_s10  ;;  %p654_p7 = scmp.lt.s32.totalorder %s648_s10, %s648_s10 }
  0x13   :  { %p655_p8 = por %p654_p7, %p653_p6 }
  0x15   :  { %p656_p9 = pnand %p655_p8, %p649_p5 }
  0x17   :  { %659 = shalt.err (!%p656_p9)
}
  0x18   :  { %46 = dma.hbm_to_vmem [thread:$0]  %s780_s5, 2048, %s41_s9, [#allocation6], %s687_s27, %s687_s27, %s688_s28  }
  0x19   :  { %680 = dma.done.wait [#allocation3], 1024  }
  0x1a   :  { %681 = vsyncadd [#allocation3], 4294966272 }
  0x1b   :  { %682 = dma.done.wait [#allocation6], 2048  }
  0x1c   :  { %683 = vsyncadd [#allocation6], 4294965248  ;;  %v690_v0 = vmov 0   ;;  %v56_v1 = vld [vmem:[%s775_s0 + $0x8] sm:$0xff]  ;;  %v55_v2 = vld [vmem:[%s775_s0] sm:$0xff]  ;;  %v691_v3 = vmov 1   ;;  %v80_v29 = vlaneseq }
  0x1d   :  { %605 = vset.pattern.permute.xlu1 %v690_v0  ;;  %603 = vset.pattern.permute.xlu0 %v690_v0  ;;  %v692_v4 = vmov 2   ;;  %v57_v5 = vld [vmem:[%s775_s0 + $0x10] sm:$0xff]  ;;  %v693_v6 = vmov 4   ;;  %v694_v7 = vmov 3   ;;  %v58_v8 = vld [vmem:[%s775_s0 + $0x18] sm:$0xff]  ;;  %v220_v11 = vld [vmem:[#allocation2 + $0x28] sm:$0xff] }
  0x1e   :  { %67 = vperm.xlu1 %605, %v56_v1   ;;  %62 = vperm.xlu0 %603, %v55_v2   ;;  %v222_v9 = vld [vmem:[#allocation2 + $0x38] sm:$0xff]  ;;  %v221_v10 = vld [vmem:[#allocation2 + $0x30] sm:$0xff]  ;;  %v219_v12 = vld [vmem:[#allocation2 + $0x20] sm:$0xff]  ;;  %v81_v32 = vshrl.u32 %v80_v29, 7  ;;  %vm230_vm0 = vcmask 523264  }
  0x1f   :  { %531 = vmatprep.subr.mxu0 %v222_v9  ;;  %v218_v13 = vld [vmem:[#allocation2 + $0x18] sm:$0xff]  ;;  %v217_v14 = vld [vmem:[#allocation2 + $0x10] sm:$0xff]  ;;  %v216_v15 = vld [vmem:[#allocation2 + $0x8] sm:$0xff] }
  0x20   :  { %532 = vmatpush3.msra.mxu0 %v222_v9  ;;  %v215_v16 = vld [vmem:[#allocation2] sm:$0xff]  ;;  %v347_v17 = vld [vmem:[#allocation5 + $0x78] sm:$0xff]  ;;  %v346_v18 = vld [vmem:[#allocation5 + $0x70] sm:$0xff]  ;;  %v82_v35 = vsub.s32 0, %v81_v32  ;;  %v106_v36 = vsub.s32 1, %v81_v32  ;;  %v134_v38 = vsub.s32 2, %v81_v32 }
  0x21   :  { %533 = vmatprep.subr.mxu0 %v221_v10  ;;  %553 = vmatprep.subr.mxu1 %v347_v17  ;;  %v345_v19 = vld [vmem:[#allocation5 + $0x68] sm:$0xff]  ;;  %v344_v20 = vld [vmem:[#allocation5 + $0x60] sm:$0xff]  ;;  %v343_v21 = vld [vmem:[#allocation5 + $0x58] sm:$0xff]  ;;  %v190_v46 = vsub.s32 4, %v81_v32  ;;  %v162_v47 = vsub.s32 3, %v81_v32 }
  0x22   :  { %606 = vset.pattern.permute.xlu1 %v691_v3  ;;  %604 = vset.pattern.permute.xlu0 %v691_v3  ;;  %v342_v22 = vld [vmem:[#allocation5 + $0x50] sm:$0xff]  ;;  %v341_v23 = vld [vmem:[#allocation5 + $0x48] sm:$0xff]  ;;  %v340_v24 = vld [vmem:[#allocation5 + $0x40] sm:$0xff] }
  0x23   :  { %93 = vperm.xlu1 %606, %v56_v1   ;;  %89 = vperm.xlu0 %604, %v55_v2   ;;  %v339_v25 = vld [vmem:[#allocation5 + $0x38] sm:$0xff]  ;;  %v338_v26 = vld [vmem:[#allocation5 + $0x30] sm:$0xff]  ;;  %v337_v27 = vld [vmem:[#allocation5 + $0x28] sm:$0xff] }
  0x24   :  { %534 = vmatpush3.msra.mxu0 %v221_v10  ;;  %554 = vmatpush3.msra.mxu1 %v347_v17  ;;  %v336_v28 = vld [vmem:[#allocation5 + $0x20] sm:$0xff] }
  0x25   :  { %535 = vmatprep.subr.mxu0 %v220_v11  ;;  %555 = vmatprep.subr.mxu1 %v346_v18  ;;  %v59_v37 = vld [vmem:[%s776_s1] sm:$0x1f] }
  0x26   :  { %536 = vmatpush3.msra.mxu0 %v220_v11  ;;  %556 = vmatpush3.msra.mxu1 %v346_v18  ;;  %v83_v40 = vrot.slane %v59_v37, %v82_v35  ;;  %v107_v41 = vrot.slane %v59_v37, %v106_v36  ;;  %v135_v43 = vrot.slane %v59_v37, %v134_v38  ;;  %v492_v60 = vld [vmem:[%s777_s2] ss:$0 sm:$0xff] }
  0x27   :  { %607 = vset.pattern.permute.xlu1 %v692_v4  ;;  %608 = vset.pattern.permute.xlu0 %v692_v4  ;;  %v191_v52 = vrot.slane %v59_v37, %v190_v46  ;;  %v163_v53 = vrot.slane %v59_v37, %v162_v47  ;;  %v332_v46 = vld [vmem:[#allocation5] sm:$0xff] }
  0x28   :  { %117 = vperm.xlu1 %607, %v55_v2   ;;  %121 = vperm.xlu0 %608, %v56_v1   ;;  %v493_v47 = vld [vmem:[%s779_s4] ss:$0 sm:$0xff]  ;;  %s695_s4 = smov [#allocation7]  }
  0x29   :  { %537 = vmatprep.subr.mxu0 %v219_v12  ;;  %557 = vmatprep.subr.mxu1 %v345_v19 }
  0x2a   :  { %538 = vmatpush3.msra.mxu0 %v219_v12  ;;  %558 = vmatpush3.msra.mxu1 %v345_v19 }
  0x2b   :  { %539 = vmatprep.subr.mxu0 %v218_v13  ;;  %559 = vmatprep.subr.mxu1 %v344_v20 }
  0x2c   :  { %609 = vset.pattern.permute.xlu1 %v690_v0  ;;  %614 = vset.pattern.permute.xlu0 %v693_v6 }
  0x2d   :  { %72 = vperm.xlu1 %609, %v57_v5   ;;  %173 = vperm.xlu0 %614, %v55_v2  }
  0x2e   :  { %540 = vmatpush3.msra.mxu0 %v218_v13  ;;  %560 = vmatpush3.msra.mxu1 %v344_v20 }
  0x2f   :  { %541 = vmatprep.subr.mxu0 %v217_v14  ;;  %561 = vmatprep.subr.mxu1 %v343_v21 }
  0x30   :  { %542 = vmatpush3.msra.mxu0 %v217_v14  ;;  %562 = vmatpush3.msra.mxu1 %v343_v21 }
  0x31   :  { %610 = vset.pattern.permute.xlu1 %v691_v3  ;;  %615 = vset.pattern.permute.xlu0 %v694_v7 }
  0x32   :  { %97 = vperm.xlu1 %610, %v57_v5   ;;  %145 = vperm.xlu0 %615, %v55_v2  }
  0x33   :  { %543 = vmatprep.subr.mxu0 %v216_v15  ;;  %563 = vmatprep.subr.mxu1 %v342_v22 }
  0x34   :  { %544 = vmatpush3.msra.mxu0 %v216_v15  ;;  %564 = vmatpush3.msra.mxu1 %v342_v22 }
  0x35   :  { %545 = vmatprep.subr.mxu0 %v215_v16  ;;  %565 = vmatprep.subr.mxu1 %v341_v23 }
  0x36   :  { %611 = vset.pattern.permute.xlu1 %v690_v0  ;;  %149 = vperm.xlu0 %615, %v56_v1  }
  0x37   :  { %77 = vperm.xlu1 %611, %v58_v8   ;;  %546 = vmatpush3.msra.mxu0 %v215_v16 }
  0x38   :  { %566 = vmatpush3.msra.mxu1 %v341_v23 }
  0x39   :  { %567 = vmatprep.subr.mxu1 %v340_v24 }
  0x3a   :  { %153 = vperm.xlu0 %615, %v57_v5   ;;  %568 = vmatpush3.msra.mxu1 %v340_v24 }
  0x3b   :  { %612 = vset.pattern.permute.xlu1 %v691_v3  ;;  %569 = vmatprep.subr.mxu1 %v339_v25 }
  0x3c   :  { %101 = vperm.xlu1 %612, %v58_v8   ;;  %570 = vmatpush3.msra.mxu1 %v339_v25 }
  0x3d   :  { %571 = vmatprep.subr.mxu1 %v338_v26 }
  0x3e   :  { %619 = vset.pattern.permute.xlu0 %v693_v6  ;;  %572 = vmatpush3.msra.mxu1 %v338_v26 }
  0x3f   :  { %185 = vperm.xlu0 %619, %v58_v8   ;;  %573 = vmatprep.subr.mxu1 %v337_v27 }
  0x40   :  { %613 = vset.pattern.permute.xlu1 %v692_v4  ;;  %574 = vmatpush3.msra.mxu1 %v337_v27 }
  0x41   :  { %125 = vperm.xlu1 %613, %v57_v5   ;;  %575 = vmatprep.subr.mxu1 %v336_v28 }
  0x42   :  { %576 = vmatpush3.msra.mxu1 %v336_v28 }
  0x45   :  { %129 = vperm.xlu1 %613, %v58_v8  }
  0x49   :  { %616 = vset.pattern.permute.xlu1 %v693_v6 }
  0x4a   :  { %177 = vperm.xlu1 %616, %v56_v1  }
  0x4e   :  { %617 = vset.pattern.permute.xlu1 %v694_v7 }
  0x4f   :  { %157 = vperm.xlu1 %617, %v58_v8  }
  0x53   :  { %618 = vset.pattern.permute.xlu1 %v693_v6 }
  0x54   :  { %181 = vperm.xlu1 %618, %v57_v5  }
  0x99   :  { %v68_v30 = vpop.permute.xlu1 %67  ;;  %v63_v31 = vpop.permute.xlu0 %62 }
  0x9a   :  { %v84_v44 = vmul.f32 %v83_v40, %v63_v31  ;;  %v85_v5 = vmul.f32 %v83_v40, %v68_v30 }
  0x9e   :  { %v94_v33 = vpop.permute.xlu1 %93  ;;  %v90_v34 = vpop.permute.xlu0 %89 }
  0x9f   :  { %v108_v45 = vmul.f32 %v107_v41, %v90_v34  ;;  %v109_v3 = vmul.f32 %v107_v41, %v94_v33 }
  0xa1   :  { %v112_v50 = vadd.f32 %v108_v45, %v84_v44  ;;  %v113_v8 = vadd.f32 %v109_v3, %v85_v5  ;;  %v334_v44 = vld [vmem:[#allocation5 + $0x10] sm:$0xff]  ;;  %v333_v45 = vld [vmem:[#allocation5 + $0x8] sm:$0xff] }
  0xa3   :  { %v118_v39 = vpop.permute.xlu1 %117  ;;  %v122_v42 = vpop.permute.xlu0 %121 }
  0xa4   :  { %v136_v51 = vmul.f32 %v135_v43, %v118_v39  ;;  %v137_v6 = vmul.f32 %v135_v43, %v122_v42 }
  0xa6   :  { %v140_v56 = vadd.f32 %v136_v51, %v112_v50  ;;  %v141_v10 = vadd.f32 %v137_v6, %v113_v8 }
  0xa8   :  { %v73_v48 = vpop.permute.xlu1 %72  ;;  %v174_v49 = vpop.permute.xlu0 %173 }
  0xa9   :  { %v192_v57 = vmul.f32 %v191_v52, %v174_v49  ;;  %v86_v19 = vmul.f32 %v83_v40, %v73_v48 }
  0xad   :  { %v98_v54 = vpop.permute.xlu1 %97  ;;  %v146_v55 = vpop.permute.xlu0 %145 }
  0xae   :  { %v164_v58 = vmul.f32 %v163_v53, %v146_v55  ;;  %v110_v14 = vmul.f32 %v107_v41, %v98_v54 }
  0xb0   :  { %v168_v59 = vadd.f32 %v164_v58, %v140_v56  ;;  %v114_v24 = vadd.f32 %v110_v14, %v86_v19 }
  0xb1   :  { %v150_v4 = vpop.permute.xlu0 %149 }
  0xb2   :  { %v78_v61 = vpop.permute.xlu1 %77  ;;  %v196_v62 = vadd.f32 %v192_v57, %v168_v59  ;;  %v165_v9 = vmul.f32 %v163_v53, %v150_v4 }
  0xb3   :  { %v87_v17 = vmul.f32 %v83_v40, %v78_v61 }
  0xb4   :  { %v207_v63 = vadd.f32 %v492_v60, %v196_v62  ;;  %v169_v15 = vadd.f32 %v165_v9, %v141_v10 }
  0xb5   :  { %v154_v11 = vpop.permute.xlu0 %153 }
  0xb6   :  { %v211_v0 = vmax.f32 %v207_v63, 0.0  ;;  %v166_v31 = vmul.f32 %v163_v53, %v154_v11 }
  0xb7   :  { %v102_v1 = vpop.permute.xlu1 %101 }
  0xb8   :  { %547 = vmatprep.mubr.msk.f32.mxu0 %vm230_vm0, %v211_v0  ;;  %v111_v12 = vmul.f32 %v107_v41, %v102_v1 }
  0xba   :  { %v186_v22 = vpop.permute.xlu0 %185  ;;  %v115_v23 = vadd.f32 %v111_v12, %v87_v17 }
  0xbb   :  { %v195_v29 = vmul.f32 %v191_v52, %v186_v22 }
  0xbc   :  { %v126_v2 = vpop.permute.xlu1 %125 }
  0xbd   :  { %v138_v20 = vmul.f32 %v135_v43, %v126_v2 }
  0xbf   :  { %v142_v30 = vadd.f32 %v138_v20, %v114_v24 }
  0xc0   :  { %v130_v7 = vpop.permute.xlu1 %129 }
  0xc1   :  { %v139_v18 = vmul.f32 %v135_v43, %v130_v7  ;;  %v170_v36 = vadd.f32 %v166_v31, %v142_v30  ;;  %v335_v43 = vld [vmem:[#allocation5 + $0x18] sm:$0xff] }
  0xc2   :  { %577 = vmatprep.subr.mxu1 %v335_v43 }
  0xc3   :  { %v143_v27 = vadd.f32 %v139_v18, %v115_v23  ;;  %578 = vmatpush3.msra.mxu1 %v335_v43 }
  0xc4   :  { %579 = vmatprep.subr.mxu1 %v334_v44 }
  0xc5   :  { %v178_v13 = vpop.permute.xlu1 %177  ;;  %580 = vmatpush3.msra.mxu1 %v334_v44 }
  0xc6   :  { %v193_v16 = vmul.f32 %v191_v52, %v178_v13  ;;  %581 = vmatprep.subr.mxu1 %v333_v45 }
  0xc7   :  { %582 = vmatpush3.msra.mxu1 %v333_v45 }
  0xc8   :  { %v197_v21 = vadd.f32 %v193_v16, %v169_v15  ;;  %583 = vmatprep.subr.mxu1 %v332_v46 }
  0xc9   :  { %584 = vmatpush3.msra.mxu1 %v332_v46 }
  0xca   :  { %v208_v25 = vadd.f32 %v492_v60, %v197_v21  ;;  %v158_v26 = vpop.permute.xlu1 %157 }
  0xcb   :  { %v167_v28 = vmul.f32 %v163_v53, %v158_v26 }
  0xcc   :  { %v212_v32 = vmax.f32 %v208_v25, 0.0 }
  0xcd   :  { %v171_v33 = vadd.f32 %v167_v28, %v143_v27 }
  0xce   :  { %548 = vmatmul.mubr.msk.f32.vlgmr.msra.gmra.mxu0 %vm230_vm0, %v212_v32 }
  0xcf   :  { %v199_v34 = vadd.f32 %v195_v29, %v171_v33  ;;  %v182_v35 = vpop.permute.xlu1 %181 }
  0xd0   :  { %v194_v37 = vmul.f32 %v191_v52, %v182_v35 }
  0xd1   :  { %v210_v39 = vadd.f32 %v492_v60, %v199_v34 }
  0xd2   :  { %v198_v38 = vadd.f32 %v194_v37, %v170_v36 }
  0xd3   :  { %v214_v42 = vmax.f32 %v210_v39, 0.0 }
  0xd4   :  { %v209_v40 = vadd.f32 %v492_v60, %v198_v38  ;;  %v498_v60 = vld [vmem:[%s781_s6] ss:$0 sm:$0xff]  ;;  %s479_s6 = sshll.u32 %s695_s4, 4  ;;  %s480_s6 = int_to_ptr.vmem [resolvable:$true] %s479_s6 }
  0xd5   :  { %s660_s24 = scalar_lea.vmem %s480_s6, 32  ;;  %p665_p11 = scmp.lt.s32.totalorder %s480_s6, %s480_s6 }
  0xd6   :  { %v213_v41 = vmax.f32 %v209_v40, 0.0  ;;  %p661_p10 = scmp.ne.s32.totalorder %s480_s6, %s660_s24  ;;  %p666_p12 = scmp.lt.s32.totalorder %s660_s24, %s660_s24 }
  0xd8   :  { %550 = vmatprep.mubr.msk.f32.mxu0 %vm230_vm0, %v213_v41  ;;  %p667_p13 = por %p666_p12, %p665_p11 }
  0xd9   :  { %551 = vmatmul.mubr.msk.f32.gmra.mxu0 %vm230_vm0, %v214_v42 }
  0xda   :  { %p668_p0 = pnand %p667_p13, %p661_p10 }
 0x18e   :  { %v549_v48 = vpop.f32.mrf.mxu0 }
 0x18f   :  { %v315_v49 = vadd.f32 %v549_v48, %v493_v47 }
 0x190   :  { %v309_v50 = vpop.f32.mrf.mxu0 }
 0x191   :  { %v310_v51 = vadd.f32 %v493_v47, %v309_v50  ;;  %v329_v53 = vmax.f32 %v315_v49, 0.0 }
 0x193   :  { %v328_v52 = vmax.f32 %v310_v51, 0.0 }
 0x195   :  { %585 = vmatprep.mubr.f32.mxu1 %v328_v52 }
 0x196   :  { %586 = vmatmul.mubr.f32.vlgmr.msra.gmra.mxu1 %v329_v53 }
 0x199   :  { %v552_v54 = vpop.f32.mrf.mxu0 }
 0x19a   :  { %v325_v55 = vadd.f32 %v552_v54, %v493_v47 }
 0x19b   :  { %v319_v56 = vpop.f32.mrf.mxu0 }
 0x19c   :  { %v320_v57 = vadd.f32 %v493_v47, %v319_v56  ;;  %v331_v59 = vmax.f32 %v325_v55, 0.0 }
 0x19e   :  { %v330_v58 = vmax.f32 %v320_v57, 0.0 }
 0x1a0   :  { %588 = vmatprep.mubr.f32.mxu1 %v330_v58 }
 0x1a1   :  { %589 = vmatmul.mubr.f32.gmra.mxu1 %v331_v59 }
 0x256   :  { %v587_v61 = vpop.f32.mrf.mxu1 }
 0x257   :  { %v427_v62 = vadd.f32 %v587_v61, %v498_v60 }
 0x258   :  { %v421_v63 = vpop.f32.mrf.mxu1 }
 0x259   :  { %v422_v0 = vadd.f32 %v498_v60, %v421_v63  ;;  %v441_v1 = vmax.f32 %v427_v62, 0.0 }
 0x25b   :  { %v440_v2 = vmax.f32 %v422_v0, 0.0 }
 0x25d   :  { %v444_v3 = vmax.f32 %v440_v2, %v441_v1 }
 0x25f   :  { %v445_v4 = vrot.slane %v444_v3, 4 }
 0x261   :  { %v446_v5 = vmax.f32 %v444_v3, %v445_v4  ;;  %v590_v6 = vpop.f32.mrf.mxu1 }
 0x262   :  { %v437_v7 = vadd.f32 %v590_v6, %v498_v60 }
 0x263   :  { %v447_v8 = vrot.slane %v446_v5, 2  ;;  %v431_v9 = vpop.f32.mrf.mxu1 }
 0x264   :  { %v432_v10 = vadd.f32 %v498_v60, %v431_v9  ;;  %v443_v12 = vmax.f32 %v437_v7, 0.0 }
 0x265   :  { %v448_v11 = vmax.f32 %v446_v5, %v447_v8 }
 0x266   :  { %v442_v13 = vmax.f32 %v432_v10, 0.0 }
 0x267   :  { %v449_v14 = vrot.slane %v448_v11, 1 }
 0x268   :  { %v451_v15 = vmax.f32 %v442_v13, %v443_v12 }
 0x269   :  { %v450_v16 = vmax.f32 %v448_v11, %v449_v14 }
 0x26a   :  { %v452_v17 = vrot.slane %v451_v15, 4 }
 0x26b   :  { %462 = vst [vmem:[#allocation7] sm:$0x1] %v450_v16 }
 0x26c   :  { %v453_v18 = vmax.f32 %v451_v15, %v452_v17 }
 0x26e   :  { %v454_v19 = vrot.slane %v453_v18, 2 }
 0x270   :  { %v455_v20 = vmax.f32 %v453_v18, %v454_v19 }
 0x272   :  { %v456_v21 = vrot.slane %v455_v20, 1 }
 0x274   :  { %v457_v22 = vmax.f32 %v455_v20, %v456_v21 }
 0x276   :  { %463 = vst [vmem:[#allocation7 + $0x1] sm:$0x1] %v457_v22 }
 0x277   :  { %671 = shalt.err (!%p668_p0)
}
 0x278   :  { %s696_s25 = smov 16   ;;  %s697_s26 = smov 1  }
 0x279   :  { %485 = dma.vmem_to_hbm [thread:$0]  %s480_s6, 32, %s782_s7, [#allocation4], %s696_s25, %s696_s25, %s697_s26  }
 0x27a   :  { %684 = dma.done.wait [#allocation4], 32  }
 0x27b   :  { %685 = vsyncadd [#allocation4], 4294967264 }
 0x27c   :  { %489 = vsyncpa [#allocation3], 1 }
 0x27d   :  { %490 = vsyncpa [#allocation6], 1 }
 0x27e   :  { %491 = vsyncpa [#allocation4], 1 }

</bundles_post_ra>
